<compile_context>
chip_gen: v5e
topology: v5e:2x2
jax: 0.10.0
libtpu: 0.0.40
codegen_flags: <defaults>
</compile_context>

<pallas_src>
import jax
import jax.numpy as jnp
from jax.experimental import pallas as pl
from jax.experimental.pallas import tpu as pltpu


def _additive_attention_kernel(q_ref, k_ref, v_ref, wq_ref, wk_ref, wv_ref,
                               out_ref, amax_ref):
    bb, S, Dq = q_ref.shape
    Dk = k_ref.shape[-1]
    Dv = v_ref.shape[-1]
    H = wq_ref.shape[-1]

    # ---- q/k projections: two MXU matmuls, f32 accumulation ------------------
    # NOTE: the (bb, S, D) -> (bb*S, D) collapse is relayout-free only when
    #       S % 8 == 0 (sublane tiling); pad S to a multiple of 8 otherwise.
    qh = jnp.dot(q_ref[...].reshape(bb * S, Dq), wq_ref[...],
                 preferred_element_type=jnp.float32)
    kh = jnp.dot(k_ref[...].reshape(bb * S, Dk), wk_ref[...],
                 preferred_element_type=jnp.float32)
    feat = jnp.tanh(qh + kh).reshape(bb, S, H)                  # (bb, S, H) f32

    # ---- scores: VPU mul + lane (XLU) reduce; keepdims so the whole softmax /
    #      aggregation path stays in the natural (bb, S, 1)/(bb, S, Dv) layout
    #      (no lane<->sublane relayout, no M=1 MXU matmuls).
    wv_row = wv_ref[...].astype(jnp.float32).reshape(1, 1, H)
    scores = jnp.sum(feat * wv_row, axis=-1, keepdims=True)     # (bb, S, 1)

    # ---- softmax over S (axis 1); exact divide for torch fidelity ------------
    m = jnp.max(scores, axis=1, keepdims=True)                  # (bb, 1, 1)
    e = jnp.exp(scores - m)                                     # (bb, S, 1)
    denom = jnp.sum(e, axis=1, keepdims=True)                   # (bb, 1, 1)
    alpha = e / denom                                           # (bb, S, 1)
    # dropout(p=0) -> identity

    # ---- weighted aggregation: VPU broadcast-multiply + sublane reduce over S.
    #      values may be bf16 (use_bf16); promotion happens in the multiply and
    #      the reduction accumulates in f32.
    agg = jnp.sum(alpha * v_ref[...], axis=1)                   # (bb, Dv) f32
    out_ref[...] = agg.astype(out_ref.dtype)

    # ---- argmax over S (first occurrence). Softmax is monotone, so the raw
    #      scores give the same index as alpha.
    idx = jax.lax.broadcasted_iota(jnp.int32, scores.shape, 1)  # (bb, S, 1)
    amax = jnp.min(jnp.where(scores == m, idx, S), axis=1)      # (bb, 1)
    amax_ref[...] = amax.astype(jnp.int32)


def _vmem_capacity_bytes():
    """Physical VMEM of the local chip; conservative fallback if unknown."""
    try:
        info = pltpu.get_tpu_info()
        for name in ("vmem_capacity_bytes", "vmem_bytes", "vmem_size_bytes"):
            cap = getattr(info, name, None)
            if cap:
                return int(cap)
    except Exception:
        pass
    return 64 * 1024 * 1024  # v7x-class per-core VMEM (most conservative)


def _pick_block_b(B, S, Dq, Dk, Dv, H, in_itemsize):
    """Largest layout-legal batch block that fits the per-generation VMEM budget."""
    vmem_cap = _vmem_capacity_bytes()
    small_vmem = vmem_cap < 100 * 1024 * 1024         # v7x-like (64 MiB per TC)
    vmem_limit = (36 if small_vmem else 64) * 1024 * 1024

    # Bytes per batch row resident during one grid step:
    #   double-buffered q/k/v input tiles, f32 intermediates (qh, kh, feat),
    #   and the alpha*values product.
    per_row = S * (2 * (Dq + Dk + Dv) * in_itemsize + 3 * H * 4 + Dv * 4)
    weight_bytes = 2 * ((Dq + Dk) * H * in_itemsize + H * 4)    # double-buffered
    budget = vmem_limit - weight_bytes - 4 * 1024 * 1024        # slack
    vmem_rows = max(1, budget // max(per_row, 1))

    block_b = max(1, min(B, vmem_rows))
    if block_b >= 8:
        block_b = (block_b // 8) * 8            # sublane-aligned tile
    elif B > block_b:
        block_b = min(B, 8)                      # smallest layout-legal tile
    # else: block_b == B (full batch -> block equals the full array dim)

    if small_vmem and B >= 16:
        # v7x megacore: keep >= 2 grid steps so the "parallel" batch axis can
        # be sharded across the two TensorCores.
        half = (pl.cdiv(B, 2) // 8) * 8
        block_b = min(block_b, max(8, half))

    return int(block_b), int(vmem_limit)


def additive_attention(queries, keys, values, wq, wk, wv, *,
                       block_b=None, use_bf16=False):
    """queries (B,S,Dq), keys (B,S,Dk), values (B,S,Dv); weights (in,out)."""
    B, S, Dq = queries.shape
    Dk = keys.shape[-1]
    Dv = values.shape[-1]
    H = wq.shape[-1]

    wv_row = wv.reshape(1, H).astype(jnp.float32)               # lane-dense row

    if use_bf16:
        # bf16 MXU operands (f32 accumulation) halve the q/k/values HBM
        # streams. Valid on v5e/v6e/v7x; tanh/exp/score math stays f32.
        queries = queries.astype(jnp.bfloat16)
        keys = keys.astype(jnp.bfloat16)
        values = values.astype(jnp.bfloat16)
        wq = wq.astype(jnp.bfloat16)
        wk = wk.astype(jnp.bfloat16)

    in_itemsize = 2 if use_bf16 else 4
    auto_block_b, vmem_limit = _pick_block_b(B, S, Dq, Dk, Dv, H, in_itemsize)
    if block_b is None:
        block_b = auto_block_b
    block_b = max(1, min(int(block_b), B))
    nb = pl.cdiv(B, block_b)

    flops = int(2 * B * S * (Dq + Dk) * H       # projections
                + 2 * B * S * H                 # score mul + reduce
                + 2 * B * S * Dv                # weighted sum
                + 6 * B * S)                    # softmax bookkeeping
    transcendentals = int(B * S * H + B * S)    # tanh + exp
    bytes_accessed = int(queries.size * queries.dtype.itemsize
                         + keys.size * keys.dtype.itemsize
                         + values.size * values.dtype.itemsize
                         + wq.size * wq.dtype.itemsize
                         + wk.size * wk.dtype.itemsize
                         + wv_row.size * 4
                         + B * Dv * 4 + B * 4)

    grid_spec = pltpu.PrefetchScalarGridSpec(
        num_scalar_prefetch=0,
        grid=(nb,),
        in_specs=[
            pl.BlockSpec((block_b, S, Dq), lambda i: (i, 0, 0)),
            pl.BlockSpec((block_b, S, Dk), lambda i: (i, 0, 0)),
            pl.BlockSpec((block_b, S, Dv), lambda i: (i, 0, 0)),
            # Constant block index -> weights stay VMEM-resident across steps.
            pl.BlockSpec((Dq, H), lambda i: (0, 0)),
            pl.BlockSpec((Dk, H), lambda i: (0, 0)),
            pl.BlockSpec((1, H), lambda i: (0, 0)),
        ],
        out_specs=(
            # NOTE: keep Dv a multiple of 128 (or equal to the full dim, as
            # here) for unmasked lane-dense stores.
            pl.BlockSpec((block_b, Dv), lambda i: (i, 0)),
            pl.BlockSpec((block_b, 1), lambda i: (i, 0)),
        ),
    )

    out_shape = (
        jax.ShapeDtypeStruct((B, Dv), jnp.float32),   # aggregated output
        jax.ShapeDtypeStruct((B, 1), jnp.int32),      # argmax indices
    )

    return pl.pallas_call(
        _additive_attention_kernel,
        out_shape=out_shape,
        grid_spec=grid_spec,
        compiler_params=pltpu.CompilerParams(
            dimension_semantics=("parallel",),
            vmem_limit_bytes=vmem_limit,
        ),
        cost_estimate=pl.CostEstimate(
            flops=flops,
            transcendentals=transcendentals,
            bytes_accessed=bytes_accessed,
        ),
    )(queries, keys, values, wq, wk, wv_row)


def reference(queries, keys, values, wq, wk, wv):
    qh = queries @ wq
    kh = keys @ wk
    feat = jnp.tanh(qh + kh)
    scores = feat @ wv                              # (B, S, 1)
    alpha = jax.nn.softmax(scores, axis=1)
    out = jnp.sum(alpha * values, axis=1)           # (B, Dv)
    amax = jnp.argmax(alpha, axis=1)                # (B, 1)
    return out, amax


if __name__ == "__main__":
    B, S = 2, 8
    query_size = 16
    key_size = 16
    num_hiddens = 32
    value_dim = 16

    key = jax.random.PRNGKey(0)
    kq, kk, kv, kwq, kwk, kwv = jax.random.split(key, 6)

    queries = jax.random.normal(kq, (B, S, query_size), dtype=jnp.float32)
    keys = jax.random.normal(kk, (B, S, key_size), dtype=jnp.float32)
    values = jax.random.normal(kv, (B, S, value_dim), dtype=jnp.float32)

    # nn.Linear(bias=False)-style init: U(-1/sqrt(fan_in), 1/sqrt(fan_in)),
    # stored as (in_features, out_features).
    def linear_init(k, fan_in, fan_out):
        bound = 1.0 / jnp.sqrt(jnp.float32(fan_in))
        return jax.random.uniform(k, (fan_in, fan_out), jnp.float32, -bound, bound)

    Wq = linear_init(kwq, query_size, num_hiddens)
    Wk = linear_init(kwk, key_size, num_hiddens)
    Wv = linear_init(kwv, num_hiddens, 1)

    out, aggr_max = additive_attention(queries, keys, values, Wq, Wk, Wv)
    jax.block_until_ready((out, aggr_max))

    ref_out, ref_amax = reference(queries, keys, values, Wq, Wk, Wv)
    # Softmax normalization is exact now; residual differences are only the
    # MXU default-precision matmul (same class as the XLA reference path).
    assert jnp.allclose(out, ref_out, atol=1e-2, rtol=1e-2), "output mismatch"
    assert jnp.all(aggr_max == ref_amax.astype(jnp.int32)), "argmax mismatch"

    print("KERNEL_OK")
</pallas_src>

<mosaic_0001>
module attributes {stable_mosaic.version = 11 : i64} {
  func.func @_additive_attention_kernel(%arg0: i32, %arg1: memref<2x8x16xf32, #tpu.memory_space<vmem>>, %arg2: memref<2x8x16xf32, #tpu.memory_space<vmem>>, %arg3: memref<2x8x16xf32, #tpu.memory_space<vmem>>, %arg4: memref<16x32xf32, #tpu.memory_space<vmem>>, %arg5: memref<16x32xf32, #tpu.memory_space<vmem>>, %arg6: memref<1x32xf32, #tpu.memory_space<vmem>>, %arg7: memref<2x16xf32, #tpu.memory_space<vmem>>, %arg8: memref<2x1xi32, #tpu.memory_space<vmem>>) attributes {dimension_semantics = [#tpu.dimension_semantics<parallel>], iteration_bounds = array<i64: 1>, scalar_prefetch = 0 : i64, scratch_operands = 0 : i64, tpu.core_type = #tpu.core_type<tc>, window_params = [{transform_indices = @transform_0, window_bounds = array<i64: 2, 8, 16>}, {transform_indices = @transform_1, window_bounds = array<i64: 2, 8, 16>}, {transform_indices = @transform_2, window_bounds = array<i64: 2, 8, 16>}, {pipeline_mode = #tpu.pipeline_mode<synchronous>, transform_indices = @transform_3, window_bounds = array<i64: 16, 32>}, {pipeline_mode = #tpu.pipeline_mode<synchronous>, transform_indices = @transform_4, window_bounds = array<i64: 16, 32>}, {pipeline_mode = #tpu.pipeline_mode<synchronous>, transform_indices = @transform_5, window_bounds = array<i64: 1, 32>}, {transform_indices = @transform_6, window_bounds = array<i64: 2, 16>}, {transform_indices = @transform_7, window_bounds = array<i64: 2, 1>}]} {
    %c0 = arith.constant 0 : index
    %c0_0 = arith.constant 0 : index
    %c0_1 = arith.constant 0 : index
    %0 = vector.load %arg1[%c0, %c0_0, %c0_1] : memref<2x8x16xf32, #tpu.memory_space<vmem>>, vector<2x8x16xf32>
    %1 = vector.shape_cast %0 : vector<2x8x16xf32> to vector<16x16xf32>
    %c0_2 = arith.constant 0 : index
    %c0_3 = arith.constant 0 : index
    %2 = vector.load %arg4[%c0_2, %c0_3] : memref<16x32xf32, #tpu.memory_space<vmem>>, vector<16x32xf32>
    %cst = arith.constant dense<0.000000e+00> : vector<16x32xf32>
    %3 = tpu.matmul %1, %2, %cst {dimension_numbers = #tpu.dot_dimension_numbers<[1], [0], [0], [1], [0, 0, 1, 1], [], []>} : vector<16x16xf32>, vector<16x32xf32>, vector<16x32xf32> -> vector<16x32xf32>
    %c0_4 = arith.constant 0 : index
    %c0_5 = arith.constant 0 : index
    %c0_6 = arith.constant 0 : index
    %4 = vector.load %arg2[%c0_4, %c0_5, %c0_6] : memref<2x8x16xf32, #tpu.memory_space<vmem>>, vector<2x8x16xf32>
    %5 = vector.shape_cast %4 : vector<2x8x16xf32> to vector<16x16xf32>
    %c0_7 = arith.constant 0 : index
    %c0_8 = arith.constant 0 : index
    %6 = vector.load %arg5[%c0_7, %c0_8] : memref<16x32xf32, #tpu.memory_space<vmem>>, vector<16x32xf32>
    %cst_9 = arith.constant dense<0.000000e+00> : vector<16x32xf32>
    %7 = tpu.matmul %5, %6, %cst_9 {dimension_numbers = #tpu.dot_dimension_numbers<[1], [0], [0], [1], [0, 0, 1, 1], [], []>} : vector<16x16xf32>, vector<16x32xf32>, vector<16x32xf32> -> vector<16x32xf32>
    %8 = arith.addf %3, %7 : vector<16x32xf32>
    %9 = math.tanh %8 : vector<16x32xf32>
    %10 = vector.shape_cast %9 : vector<16x32xf32> to vector<2x8x32xf32>
    %c0_10 = arith.constant 0 : index
    %c0_11 = arith.constant 0 : index
    %11 = vector.load %arg6[%c0_10, %c0_11] : memref<1x32xf32, #tpu.memory_space<vmem>>, vector<1x32xf32>
    %12 = vector.shape_cast %11 : vector<1x32xf32> to vector<1x1x32xf32>
    %13 = vector.broadcast %12 : vector<1x1x32xf32> to vector<2x8x32xf32>
    %14 = arith.mulf %10, %13 : vector<2x8x32xf32>
    %cst_12 = arith.constant dense<0.000000e+00> : vector<2x8xf32>
    %15 = vector.multi_reduction <add>, %14, %cst_12 [2] : vector<2x8x32xf32> to vector<2x8xf32>
    %16 = vector.shape_cast %15 : vector<2x8xf32> to vector<2x8x1xf32>
    %cst_13 = arith.constant dense<0xFF800000> : vector<2x1xf32>
    %17 = vector.multi_reduction <maximumf>, %16, %cst_13 [1] : vector<2x8x1xf32> to vector<2x1xf32>
    %18 = vector.shape_cast %17 : vector<2x1xf32> to vector<2x1x1xf32>
    %19 = vector.broadcast %18 : vector<2x1x1xf32> to vector<2x8x1xf32>
    %20 = arith.subf %16, %19 : vector<2x8x1xf32>
    %21 = math.exp %20 : vector<2x8x1xf32>
    %cst_14 = arith.constant dense<0.000000e+00> : vector<2x1xf32>
    %22 = vector.multi_reduction <add>, %21, %cst_14 [1] : vector<2x8x1xf32> to vector<2x1xf32>
    %23 = vector.shape_cast %22 : vector<2x1xf32> to vector<2x1x1xf32>
    %24 = vector.broadcast %23 : vector<2x1x1xf32> to vector<2x8x1xf32>
    %25 = arith.divf %21, %24 : vector<2x8x1xf32>
    %c0_15 = arith.constant 0 : index
    %c0_16 = arith.constant 0 : index
    %c0_17 = arith.constant 0 : index
    %26 = vector.load %arg3[%c0_15, %c0_16, %c0_17] : memref<2x8x16xf32, #tpu.memory_space<vmem>>, vector<2x8x16xf32>
    %27 = vector.broadcast %25 : vector<2x8x1xf32> to vector<2x8x16xf32>
    %28 = arith.mulf %27, %26 : vector<2x8x16xf32>
    %cst_18 = arith.constant dense<0.000000e+00> : vector<2x16xf32>
    %29 = vector.multi_reduction <add>, %28, %cst_18 [1] : vector<2x8x16xf32> to vector<2x16xf32>
    %c0_19 = arith.constant 0 : index
    %c0_20 = arith.constant 0 : index
    %30 = vector.load %arg7[%c0_19, %c0_20] : memref<2x16xf32, #tpu.memory_space<vmem>>, vector<2x16xf32>
    tpu.vector_store %arg7[%c0_19, %c0_20], %29 {strides = array<i32>} : memref<2x16xf32, #tpu.memory_space<vmem>>, vector<2x16xf32>,
    %31 = tpu.iota {dimensions = array<i32: 1>} : vector<2x8x1xi32>
    %32 = vector.broadcast %18 : vector<2x1x1xf32> to vector<2x8x1xf32>
    %33 = arith.cmpf oeq, %16, %32 : vector<2x8x1xf32>
    %c8_i32 = arith.constant 8 : i32
    %34 = vector.broadcast %c8_i32 : i32 to vector<2x8x1xi32>
    %35 = arith.select %33, %31, %34 : vector<2x8x1xi1>, vector<2x8x1xi32>
    %cst_21 = arith.constant dense<2147483647> : vector<2x1xi32>
    %36 = vector.multi_reduction <minsi>, %35, %cst_21 [1] : vector<2x8x1xi32> to vector<2x1xi32>
    %c0_22 = arith.constant 0 : index
    %c0_23 = arith.constant 0 : index
    %37 = vector.load %arg8[%c0_22, %c0_23] : memref<2x1xi32, #tpu.memory_space<vmem>>, vector<2x1xi32>
    tpu.vector_store %arg8[%c0_22, %c0_23], %36 {strides = array<i32>} : memref<2x1xi32, #tpu.memory_space<vmem>>, vector<2x1xi32>,
    return
  }
  func.func @transform_0(%arg0: i32) -> (i32, i32, i32) {
    %c0_i32 = arith.constant 0 : i32
    %c0_i32_0 = arith.constant 0 : i32
    %c0_i32_1 = arith.constant 0 : i32
    return %arg0, %c0_i32, %c0_i32_0 : i32, i32, i32
  }
  func.func @transform_1(%arg0: i32) -> (i32, i32, i32) {
    %c0_i32 = arith.constant 0 : i32
    %c0_i32_0 = arith.constant 0 : i32
    %c0_i32_1 = arith.constant 0 : i32
    return %arg0, %c0_i32, %c0_i32_0 : i32, i32, i32
  }
  func.func @transform_2(%arg0: i32) -> (i32, i32, i32) {
    %c0_i32 = arith.constant 0 : i32
    %c0_i32_0 = arith.constant 0 : i32
    %c0_i32_1 = arith.constant 0 : i32
    return %arg0, %c0_i32, %c0_i32_0 : i32, i32, i32
  }
  func.func @transform_3(%arg0: i32) -> (i32, i32) {
    %c0_i32 = arith.constant 0 : i32
    %c0_i32_0 = arith.constant 0 : i32
    %c0_i32_1 = arith.constant 0 : i32
    return %c0_i32, %c0_i32_0 : i32, i32
  }
  func.func @transform_4(%arg0: i32) -> (i32, i32) {
    %c0_i32 = arith.constant 0 : i32
    %c0_i32_0 = arith.constant 0 : i32
    %c0_i32_1 = arith.constant 0 : i32
    return %c0_i32, %c0_i32_0 : i32, i32
  }
  func.func @transform_5(%arg0: i32) -> (i32, i32) {
    %c0_i32 = arith.constant 0 : i32
    %c0_i32_0 = arith.constant 0 : i32
    %c0_i32_1 = arith.constant 0 : i32
    return %c0_i32, %c0_i32_0 : i32, i32
  }
  func.func @transform_6(%arg0: i32) -> (i32, i32) {
    %c0_i32 = arith.constant 0 : i32
    %c0_i32_0 = arith.constant 0 : i32
    return %arg0, %c0_i32 : i32, i32
  }
  func.func @transform_7(%arg0: i32) -> (i32, i32) {
    %c0_i32 = arith.constant 0 : i32
    %c0_i32_0 = arith.constant 0 : i32
    return %arg0, %c0_i32 : i32, i32
  }
}

</mosaic_0001>

<bundles_post_ra>
// kernel: tpu_custom_call.1
= control target key start
LH: loop header
LB: loop body
LE: loop exit
PB: predicated region body
PF: predicated region fallthrough
CT: control target
= control target key end

     0   :  { %13 = vsyncpa [#allocation3], 0  ;;  %s582_s0 = inlined_call_operand.hbm [shape: f32[2,8,16], index: 0, kind: input, shape index: {}]   ;;  %s583_s1 = inlined_call_operand.hbm [shape: f32[2,8,16], index: 1, kind: input, shape index: {}]   ;;  %s584_s2 = inlined_call_operand.hbm [shape: f32[2,8,16], index: 2, kind: input, shape index: {}]   ;;  %s585_s3 = inlined_call_operand.hbm [shape: f32[16,32], index: 3, kind: input, shape index: {}]   ;;  %s586_s4 = inlined_call_operand.hbm [shape: f32[16,32], index: 4, kind: input, shape index: {}]   ;;  %s587_s5 = inlined_call_operand.vmem [shape: f32[1,32], index: 5, kind: input, shape index: {}]   ;;  %s588_s6 = inlined_call_operand.hbm [shape: f32[2,16], index: 6, kind: output, shape index: {0}]   ;;  %s589_s7 = inlined_call_operand.vmem [shape: s32[2,1], index: 7, kind: output, shape index: {1}]  }
   0x1   :  { %14 = vsyncpa [#allocation6], 0 }
   0x2   :  { %15 = vsyncpa [#allocation9], 0 }
   0x3   :  { %16 = vsyncpa [#allocation4], 0  ;;  %s34_s26 = sshll.u32 %s583_s1, 4  ;;  %s502_s27 = smov [#allocation5]   ;;  %s35_s26 = int_to_ptr.hbm [resolvable:$true] %s34_s26 }
   0x4   :  { %s36_s28 = sshll.u32 %s502_s27, 4  ;;  %s60_s8 = sshll.u32 %s585_s3, 4  ;;  %s37_s28 = int_to_ptr.vmem [resolvable:$true] %s36_s28  ;;  %s61_s8 = int_to_ptr.hbm [resolvable:$true] %s60_s8 }
   0x5   :  { %s503_s9 = smov 128   ;;  %s504_s10 = smov 8  }
   0x6   :  { %42 = dma.hbm_to_vmem [thread:$0]  %s35_s26, 256, %s37_s28, [#allocation6], %s503_s9, %s503_s9, %s504_s10  }
   0x7   :  { %s505_s11 = smov [#allocation8]   ;;  %s21_s15 = sshll.u32 %s582_s0, 4  ;;  %s22_s15 = int_to_ptr.hbm [resolvable:$true] %s21_s15 }
   0x8   :  { %s62_s12 = sshll.u32 %s505_s11, 4  ;;  %s47_s17 = sshll.u32 %s584_s2, 4  ;;  %s63_s12 = int_to_ptr.vmem [resolvable:$true] %s62_s12  ;;  %s48_s17 = int_to_ptr.hbm [resolvable:$true] %s47_s17 }
   0x9   :  { %68 = dma.hbm_to_vmem [thread:$0]  %s61_s8, 256, %s63_s12, [#allocation9], %s503_s9, %s503_s9, %s504_s10  }
   0xa   :  { %s506_s18 = smov [#allocation2]   ;;  %s507_s3 = smov [#allocation7]  }
   0xb   :  { %s23_s19 = sshll.u32 %s506_s18, 4  ;;  %s49_s20 = sshll.u32 %s507_s3, 4  ;;  %s24_s19 = int_to_ptr.vmem [resolvable:$true] %s23_s19  ;;  %s50_s20 = int_to_ptr.vmem [resolvable:$true] %s49_s20 }
   0xc   :  { %29 = dma.hbm_to_vmem [thread:$0]  %s22_s15, 256, %s24_s19, [#allocation3], %s503_s9, %s503_s9, %s504_s10  }
   0xd   :  { %s73_s23 = sshll.u32 %s586_s4, 4  ;;  %s508_s0 = smov [#allocation10]   ;;  %s74_s23 = int_to_ptr.hbm [resolvable:$true] %s73_s23 }
   0xe   :  { %55 = dma.hbm_to_vmem [thread:$0]  %s48_s17, 256, %s50_s20, [#allocation6], %s503_s9, %s503_s9, %s504_s10  }
   0xf   :  { %s75_s24 = sshll.u32 %s508_s0, 4  ;;  %s76_s24 = int_to_ptr.vmem [resolvable:$true] %s75_s24 }
  0x10   :  { %81 = dma.hbm_to_vmem [thread:$0]  %s74_s23, 256, %s76_s24, [#allocation9], %s503_s9, %s503_s9, %s504_s10  }
  0x11   :  { %494 = dma.done.wait [#allocation3], 256  }
  0x12   :  { %495 = vsyncadd [#allocation3], 4294967040 }
  0x13   :  { %496 = dma.done.wait [#allocation6], 512  }
  0x14   :  { %497 = vsyncadd [#allocation6], 4294966784 }
  0x15   :  { %498 = dma.done.wait [#allocation9], 512  }
  0x16   :  { %499 = vsyncadd [#allocation9], 4294966784  ;;  %v111_v0 = vld [vmem:[#allocation10 + $0x8] sm:$0xff]  ;;  %v107_v1 = vld [vmem:[#allocation8 + $0x8] sm:$0xff]  ;;  %vm112_vm0 = vcmask 130048   ;;  %vm179_vm1 = vcmask 261120   ;;  %v271_v25 = vlaneseq }
  0x17   :  { %v110_v2 = vld [vmem:[#allocation10] sm:$0xff]  ;;  %133 = vmatpush.msra.mxu0 %v111_v0  ;;  %162 = vmatpush.msra.mxu1 %v107_v1  ;;  %v106_v3 = vld [vmem:[#allocation8] sm:$0xff]  ;;  %v109_v6 = vld [vmem:[#allocation5 + $0x8] sm:$0xff]  ;;  %vm266_vm9 = vcmask 1041409   ;;  %vm296_vm11 = vcmask 1024   ;;  %s305_s29 = sshll.u32 %s588_s6, 4  ;;  %s306_s29 = int_to_ptr.hbm [resolvable:$true] %s305_s29 }
  0x18   :  { %v108_v4 = vld [vmem:[#allocation5] sm:$0xff]  ;;  %v104_v5 = vld [vmem:[#allocation2] sm:$0xff]  ;;  %325 = vmatpush.msra.mxu2 %v111_v0  ;;  %327 = vmatpush.msra.mxu3 %v107_v1  ;;  %v105_v7 = vld [vmem:[#allocation2 + $0x8] sm:$0xff]  ;;  %v272_v30 = vshrl.u32 %v271_v25, 7 }
  0x19   :  { %134 = vmatpush.msra.mxu0 %v110_v2  ;;  %163 = vmatpush.msra.mxu1 %v106_v3  ;;  %v337_v11 = vld [vmem:[%s587_s5] ss:$0 sm:$0xff] }
  0x1a   :  { %321 = vmatmul.msk.f32.vlgmr.msra.gmra.mxu0 %vm112_vm0, %v108_v4  ;;  %323 = vmatmul.msk.f32.vlgmr.msra.gmra.mxu1 %vm112_vm0, %v104_v5 }
  0x1b   :  { %326 = vmatpush.msra.mxu2 %v110_v2  ;;  %328 = vmatpush.msra.mxu3 %v106_v3 }
  0x1c   :  { %322 = vmatmul.msk.f32.vlgmr.msra.gmra.mxu2 %vm112_vm0, %v109_v6  ;;  %324 = vmatmul.msk.f32.vlgmr.msra.gmra.mxu3 %vm112_vm0, %v105_v7 }
  0x97   :  { %v136_v8 = vpop.f32.mrf.mxu0  ;;  %v165_v9 = vpop.f32.mrf.mxu1 }
  0x98   :  { %v166_v10 = vadd.f32 %v165_v9, %v136_v8 }
  0x9a   :  { %338 = vtanh.f32 %v166_v10 }
  0x9f   :  { %v139_v12 = vpop.f32.mrf.mxu2  ;;  %v168_v13 = vpop.f32.mrf.mxu3 }
  0xa0   :  { %v339_v14 = vpop.eup %338  ;;  %v169_v15 = vadd.f32 %v168_v13, %v139_v12 }
  0xa1   :  { %v177_v16 = vmul.f32 %v339_v14, %v337_v11 }
  0xa2   :  { %340 = vtanh.f32 %v169_v15 }
  0xa3   :  { %v180_v17 = vsel %vm179_vm1, %v177_v16, 0.0 }
  0xa4   :  { %181 = vadd.xlane.f32.xlu0 %v180_v17 }
  0xa8   :  { %v341_v18 = vpop.eup %340 }
  0xa9   :  { %v178_v19 = vmul.f32 %v341_v18, %v337_v11  ;;  %v246_v18 = vld [vmem:[#allocation7] sm:$0xff] }
  0xab   :  { %v183_v20 = vsel %vm179_vm1, %v178_v19, 0.0 }
  0xac   :  { %184 = vadd.xlane.f32.xlu0 %v183_v20 }
 0x117   :  { %v182_v21 = vpop.xlane.xlu0 %181 }
 0x118   :  { %v186_v22 = vrot.slane %v182_v21, 4 }
 0x11a   :  { %v187_v23 = vmax.f32 %v182_v21, %v186_v22 }
 0x11c   :  { %v188_v24 = vrot.slane %v187_v23, 2 }
 0x11e   :  { %v189_v26 = vmax.f32 %v187_v23, %v188_v24 }
 0x11f   :  { %v185_v27 = vpop.xlane.xlu0 %184 }
 0x120   :  { %v190_v28 = vrot.slane %v189_v26, 1  ;;  %v192_v29 = vrot.slane %v185_v27, 4 }
 0x122   :  { %v191_v31 = vmax.f32 %v189_v26, %v190_v28  ;;  %v193_v32 = vmax.f32 %v185_v27, %v192_v29 }
 0x124   :  { %v198_v33 = vsub.f32 %v182_v21, %v191_v31  ;;  %vm273_vm2 = vcmp.eq.f32.partialorder %v182_v21, %v191_v31  ;;  %v194_v34 = vrot.slane %v193_v32, 2  ;;  %v247_v31 = vld [vmem:[#allocation7 + $0x8] sm:$0xff] }
 0x125   :  { %v275_v35 = vsel %vm273_vm2, %v272_v30, 8 }
 0x126   :  { %v200_v36 = vmul.f32 1.442695, %v198_v33  ;;  %v277_v37 = vrot.slane %v275_v35, 4  ;;  %v195_v38 = vmax.f32 %v193_v32, %v194_v34 }
 0x128   :  { %342 = vpow2.f32 %v200_v36  ;;  %vm278_vm3 = vcmp.lt.s32.totalorder %v275_v35, %v277_v37  ;;  %v196_v39 = vrot.slane %v195_v38, 1 }
 0x129   :  { %v279_v40 = vsel %vm278_vm3, %v275_v35, %v277_v37 }
 0x12a   :  { %v280_v41 = vrot.slane %v279_v40, 2  ;;  %v197_v42 = vmax.f32 %v195_v38, %v196_v39 }
 0x12c   :  { %vm281_vm4 = vcmp.lt.s32.totalorder %v279_v40, %v280_v41  ;;  %v199_v43 = vsub.f32 %v185_v27, %v197_v42  ;;  %vm274_vm5 = vcmp.eq.f32.partialorder %v185_v27, %v197_v42 }
 0x12d   :  { %v276_v44 = vsel %vm274_vm5, %v272_v30, 8  ;;  %v282_v49 = vsel %vm281_vm4, %v279_v40, %v280_v41  ;;  %vm269_vm5 = vcmask 123904  }
 0x12e   :  { %v343_v45 = vpop.eup %342  ;;  %v202_v46 = vmul.f32 1.442695, %v199_v43  ;;  %v286_v47 = vrot.slane %v276_v44, 4  ;;  %v283_v52 = vrot.slane %v282_v49, 1 }
 0x12f   :  { %v204_v48 = vrot.slane %v343_v45, 4 }
 0x130   :  { %344 = vpow2.f32 %v202_v46  ;;  %vm287_vm6 = vcmp.lt.s32.totalorder %v276_v44, %v286_v47  ;;  %vm284_vm8 = vcmp.lt.s32.totalorder %v282_v49, %v283_v52 }
 0x131   :  { %v205_v50 = vadd.f32 %v343_v45, %v204_v48  ;;  %v288_v51 = vsel %vm287_vm6, %v276_v44, %v286_v47  ;;  %v285_v0 = vsel %vm284_vm8, %v282_v49, %v283_v52 }
 0x132   :  { %v289_v53 = vrot.slane %v288_v51, 2 }
 0x133   :  { %v206_v54 = vrot.slane %v205_v50, 2 }
 0x134   :  { %vm290_vm7 = vcmp.lt.s32.totalorder %v288_v51, %v289_v53 }
 0x135   :  { %v207_v55 = vadd.f32 %v206_v54, %v205_v50  ;;  %v291_v56 = vsel %vm290_vm7, %v288_v51, %v289_v53 }
 0x136   :  { %v345_v57 = vpop.eup %344  ;;  %v292_v58 = vrot.slane %v291_v56, 1 }
 0x137   :  { %v208_v59 = vrot.slane %v207_v55, 1  ;;  %v210_v60 = vrot.slane %v345_v57, 4 }
 0x138   :  { %vm293_vm10 = vcmp.lt.s32.totalorder %v291_v56, %v292_v58 }
 0x139   :  { %v209_v61 = vadd.f32 %v208_v59, %v207_v55  ;;  %v211_v62 = vadd.f32 %v345_v57, %v210_v60  ;;  %v294_v63 = vsel %vm293_vm10, %v291_v56, %v292_v58 }
 0x13a   :  { %v295_v1 = vsel %vm266_vm9, %v294_v63, %v285_v0 }
 0x13b   :  { %346 = vrcp.f32 %v209_v61  ;;  %v212_v2 = vrot.slane %v211_v62, 2  ;;  %297 = vst.msk [vmem:[%s589_s7] sm:$0x3] %vm296_vm11, %v295_v1  ;;  %v227_v9 = vand.u32 2147483648, %v209_v61  ;;  %v225_v11 = vand.u32 2147483647, %v209_v61 }
 0x13c   :  { %vm221_vm13 = vweird.f32 %v209_v61  ;;  %s509_s7 = smov [#allocation11]  }
 0x13d   :  { %v213_v3 = vadd.f32 %v212_v2, %v211_v62  ;;  %v228_v14 = vor.u32 1.1754944e-38, %v227_v9  ;;  %vm226_vm15 = vcmp.eq.f32.partialorder %v225_v11, 8.507059e+37  ;;  %s303_s26 = sshll.u32 %s509_s7, 4  ;;  %s304_s26 = int_to_ptr.vmem [resolvable:$true] %s303_s26 }
 0x13f   :  { %v214_v4 = vrot.slane %v213_v3, 1 }
 0x141   :  { %v347_v5 = vpop.eup %346  ;;  %v215_v6 = vadd.f32 %v214_v4, %v213_v3 }
 0x142   :  { %v217_v7 = vmul.f32 %v347_v5, %v209_v61  ;;  %vm222_vm12 = vweird.f32 %v347_v5 }
 0x143   :  { %348 = vrcp.f32 %v215_v6  ;;  %vm223_vm14 = vmor %vm221_vm13, %vm222_vm12  ;;  %v242_v21 = vand.u32 2147483648, %v215_v6  ;;  %v240_v23 = vand.u32 2147483647, %v215_v6  ;;  %vm236_vm2 = vweird.f32 %v215_v6 }
 0x144   :  { %v218_v8 = vsub.f32 1.0, %v217_v7 }
 0x145   :  { %v243_v27 = vor.u32 1.1754944e-38, %v242_v21  ;;  %vm241_vm4 = vcmp.eq.f32.partialorder %v240_v23, 8.507059e+37 }
 0x146   :  { %v219_v10 = vmul.f32 %v347_v5, %v218_v8 }
 0x148   :  { %v220_v12 = vadd.f32 %v347_v5, %v219_v10 }
 0x149   :  { %v349_v13 = vpop.eup %348 }
 0x14a   :  { %v224_v15 = vsel %vm223_vm14, %v347_v5, %v220_v12  ;;  %v232_v16 = vmul.f32 %v349_v13, %v215_v6  ;;  %vm237_vm1 = vweird.f32 %v349_v13 }
 0x14b   :  { %v229_v17 = vsel %vm226_vm15, %v228_v14, %v224_v15  ;;  %vm238_vm3 = vmor %vm236_vm2, %vm237_vm1 }
 0x14c   :  { %v230_v19 = vmul.f32 %v343_v45, %v229_v17  ;;  %v233_v20 = vsub.f32 1.0, %v232_v16 }
 0x14e   :  { %v234_v22 = vmul.f32 %v349_v13, %v233_v20  ;;  %v248_v24 = vmul.f32 %v246_v18, %v230_v19 }
 0x150   :  { %v235_v25 = vadd.f32 %v349_v13, %v234_v22  ;;  %v250_v26 = vsel %vm112_vm0, %v248_v24, 0.0 }
 0x151   :  { %v251_v28 = vrot.slane %v250_v26, 4 }
 0x152   :  { %v239_v29 = vsel %vm238_vm3, %v349_v13, %v235_v25 }
 0x153   :  { %v244_v30 = vsel %vm241_vm4, %v243_v27, %v239_v29  ;;  %v252_v32 = vadd.f32 %v251_v28, %v250_v26 }
 0x154   :  { %v245_v33 = vmul.f32 %v345_v57, %v244_v30 }
 0x155   :  { %v253_v35 = vrot.slane %v252_v32, 2 }
 0x156   :  { %v249_v34 = vmul.f32 %v247_v31, %v245_v33 }
 0x157   :  { %v254_v38 = vadd.f32 %v253_v35, %v252_v32 }
 0x158   :  { %v257_v36 = vsel %vm112_vm0, %v249_v34, 0.0 }
 0x159   :  { %v258_v37 = vrot.slane %v257_v36, 4  ;;  %v255_v41 = vrot.slane %v254_v38, 1 }
 0x15b   :  { %v259_v39 = vadd.f32 %v258_v37, %v257_v36  ;;  %v256_v44 = vadd.f32 %v255_v41, %v254_v38 }
 0x15d   :  { %v260_v40 = vrot.slane %v259_v39, 2 }
 0x15f   :  { %v261_v42 = vadd.f32 %v260_v40, %v259_v39 }
 0x161   :  { %v262_v43 = vrot.slane %v261_v42, 1 }
 0x163   :  { %v263_v45 = vadd.f32 %v262_v43, %v261_v42 }
 0x165   :  { %v267_v46 = vsel %vm266_vm9, %v263_v45, %v256_v44 }
 0x166   :  { %270 = vst.msk [vmem:[#allocation11] sm:$0x3] %vm269_vm5, %v267_v46 }
 0x167   :  { %308 = dma.vmem_to_hbm [thread:$0]  %s304_s26, 32, %s306_s29, [#allocation4]  }
 0x168   :  { %500 = dma.done.wait [#allocation4], 32  }
 0x169   :  { %501 = vsyncadd [#allocation4], 4294967264 }
 0x16a   :  { %317 = vsyncpa [#allocation3], 1 }
 0x16b   :  { %318 = vsyncpa [#allocation6], 1 }
 0x16c   :  { %319 = vsyncpa [#allocation9], 1 }
 0x16d   :  { %320 = vsyncpa [#allocation4], 1 }

</bundles_post_ra>
